<compile_context>
chip_gen: v7x
topology: tpu7x:2x2x1
jax: 0.10.0
libtpu: 0.0.40
codegen_flags: <defaults>
</compile_context>

<pallas_src>
import numpy as np
import jax
import jax.numpy as jnp
from jax import lax
from jax.experimental import pallas as pl
from jax.experimental.pallas import tpu as pltpu


def _round_up(x, m):
    return ((x + m - 1) // m) * m


def _choose_g(B, Mp, Dp, flat, vmem_budget=40 << 20, target_rows=512):
    """Graphs per grid step: ~512 fused MXU rows, VMEM-aware, >=2 grid steps when B>=2."""
    g = max(1, min(B, target_rows // max(Mp, 1)))
    if B >= 2 and g >= B:
        g = max(1, -(-B // 2))  # guarantee >= 2 grid steps so v7x's 2nd TC isn't idle

    def est(gg):
        gm = gg * Mp
        xio = 2 * 2 * gm * Dp * 2                  # x & out blocks, double-buffered, bf16
        wgt = 2 * (Dp * 3 * Dp * 2 + 3 * Dp * 4)   # Wqkv (bf16) + bqkv (f32), 2 buffers
        inter = 10 * gm * Dp * 4                   # qkv / q / k / v / att f32 intermediates
        sc = (5 * gm * gm * 4) if flat else (4 * gg * Mp * Mp * 4)   # scores / exp / w (+mask)
        return xio + wgt + inter + sc

    while g > 1 and est(g) > vmem_budget:
        g -= 1
    return g, est(g)


def _make_flat_kernel(G, Mp, Dp):
    """Block-diagonal flat attention: one fat MXU matmul for all G graphs in the block."""
    GM = G * Mp

    def kernel(x_ref, wqkv_ref, bqkv_ref, kmask_ref, bmask_ref, flag_ref, o_ref):
        xb = x_ref[...]                                       # bf16 [G, Mp, Dp]
        xf = xb.reshape(GM, Dp)                               # fuse graphs for the MXU
        qkv = jnp.dot(xf, wqkv_ref[...],
                      preferred_element_type=jnp.float32) + bqkv_ref[...]   # [GM, 3Dp] f32
        q = qkv[:, :Dp].astype(jnp.bfloat16)
        k = qkv[:, Dp:2 * Dp].astype(jnp.bfloat16)
        v = qkv[:, 2 * Dp:].astype(jnp.bfloat16)

        # One (GM x GM) score matmul; contraction on last dims (no explicit transpose).
        s = lax.dot_general(q, k, (((1,), (1,)), ((), ())),
                            preferred_element_type=jnp.float32)             # [GM, GM] f32
        s = s + bmask_ref[...] + kmask_ref[...].reshape(1, GM)              # f32 masks

        mx = jnp.max(s, axis=-1, keepdims=True)
        e = jnp.exp(s - mx)
        w = e * pl.reciprocal(jnp.sum(e, axis=-1, keepdims=True), approx=True)
        att = jnp.dot(w.astype(jnp.bfloat16), v,
                      preferred_element_type=jnp.float32)                   # [GM, Dp] f32

        # Graphs with <= 1 node: identity pass-through (matches PyTorch reference).
        out = jnp.where(flag_ref[...] > 0.0,
                        xb.astype(jnp.float32),
                        att.reshape(G, Mp, Dp))
        o_ref[...] = out.astype(o_ref.dtype)

    return kernel


def _make_batched_kernel(G, Mp, Dp):
    """Per-graph batched attention for large Mp (keeps score FLOPs at G*Mp^2)."""

    def kernel(x_ref, wqkv_ref, bqkv_ref, kmask_ref, flag_ref, o_ref):
        xb = x_ref[...]                                       # bf16 [G, Mp, Dp]
        xf = xb.reshape(G * Mp, Dp)
        qkv = jnp.dot(xf, wqkv_ref[...],
                      preferred_element_type=jnp.float32) + bqkv_ref[...]
        q = qkv[:, :Dp].reshape(G, Mp, Dp).astype(jnp.bfloat16)
        k = qkv[:, Dp:2 * Dp].reshape(G, Mp, Dp).astype(jnp.bfloat16)
        v = qkv[:, 2 * Dp:].reshape(G, Mp, Dp).astype(jnp.bfloat16)

        s = jnp.einsum('gmd,gnd->gmn', q, k,
                       preferred_element_type=jnp.float32)    # [G, Mp, Mp] f32
        s = s + kmask_ref[...]                                # [G, 1, Mp] key mask

        mx = jnp.max(s, axis=-1, keepdims=True)
        e = jnp.exp(s - mx)
        w = e * pl.reciprocal(jnp.sum(e, axis=-1, keepdims=True), approx=True)
        att = jnp.einsum('gmn,gnd->gmd', w.astype(jnp.bfloat16), v,
                         preferred_element_type=jnp.float32)  # [G, Mp, Dp] f32

        o_ref[...] = jnp.where(flag_ref[...] > 0.0,
                               xb.astype(jnp.float32), att).astype(o_ref.dtype)

    return kernel


def structural_attention(x, batch, Wq, Wk, Wv, bq, bk, bv, B, M):
    """Full module forward. x: [N, D] f32, batch: [N] int32 (sorted, contiguous graphs)."""
    N, D = x.shape
    scale = jnp.sqrt(jnp.float32(D))

    Dp = _round_up(max(D, 128), 128)          # lane-dense feature dim
    Mp = _round_up(max(M, 8), 8)              # sublane-aligned node dim
    use_flat = Mp < 64                        # FLOP gate for block-diagonal packing
    G, est_bytes = _choose_g(B, Mp, Dp, use_flat)
    Bp = _round_up(B, G)
    GM = G * Mp

    counts = jnp.bincount(batch, length=B).astype(jnp.int32)
    offsets = jnp.concatenate([jnp.zeros((1,), jnp.int32),
                               jnp.cumsum(counts)[:-1].astype(jnp.int32)])
    pos = jnp.arange(N, dtype=jnp.int32) - offsets[batch]        # position within graph
    counts_p = jnp.zeros((Bp,), jnp.int32).at[:B].set(counts)

    # Dense padded node tensor [Bp, Mp, Dp], stored bf16 in HBM (half the DMA bytes).
    x_feat = jnp.zeros((N, Dp), jnp.bfloat16).at[:, :D].set(x.astype(jnp.bfloat16))
    x_pad = jnp.zeros((Bp, Mp, Dp), jnp.bfloat16).at[batch, pos].set(x_feat)

    # Fused + padded QKV weights in bf16 (MXU-native); 1/sqrt(D) folded into Q.
    # Biases stay f32 and are added after the f32-accumulated matmul.
    Wqkv = jnp.zeros((Dp, 3 * Dp), jnp.float32)
    Wqkv = Wqkv.at[:D, 0:D].set(Wq / scale)
    Wqkv = Wqkv.at[:D, Dp:Dp + D].set(Wk)
    Wqkv = Wqkv.at[:D, 2 * Dp:2 * Dp + D].set(Wv)
    Wqkv = Wqkv.astype(jnp.bfloat16)
    bqkv = jnp.zeros((1, 3 * Dp), jnp.float32)
    bqkv = bqkv.at[0, 0:D].set(bq[0] / scale)
    bqkv = bqkv.at[0, Dp:Dp + D].set(bk[0])
    bqkv = bqkv.at[0, 2 * Dp:2 * Dp + D].set(bv[0])

    # Finite additive key mask (0 valid / -1e30 padded), kept in f32.
    key_idx = jnp.arange(Mp, dtype=jnp.int32)
    kmask_rows = jnp.where(key_idx[None, :] < counts_p[:, None], 0.0, -1e30)
    kmask_rows = kmask_rows.astype(jnp.float32)                  # [Bp, Mp]
    pass_flag = (counts_p <= 1).astype(jnp.float32)[:, None, None]  # [Bp, 1, 1]

    common_specs = [
        pl.BlockSpec((G, Mp, Dp), lambda g: (g, 0, 0)),          # x_pad (bf16)
        pl.BlockSpec((Dp, 3 * Dp), lambda g: (0, 0)),            # fused Wqkv (bf16)
        pl.BlockSpec((1, 3 * Dp), lambda g: (0, 0)),             # fused bqkv (f32)
    ]
    flag_spec = pl.BlockSpec((G, 1, 1), lambda g: (g, 0, 0))

    if use_flat:
        # Key mask flattened per grid step: [num_steps, 1, G*Mp].
        kmask_op = kmask_rows.reshape(Bp // G, 1, GM)
        # Constant block-diagonal additive mask (graphs only attend within their block).
        gid = jnp.repeat(jnp.arange(G, dtype=jnp.int32), Mp)
        bmask = jnp.where(gid[:, None] == gid[None, :], 0.0, -1e30).astype(jnp.float32)
        in_specs = common_specs + [
            pl.BlockSpec((1, 1, GM), lambda g: (g, 0, 0)),       # flat key mask
            pl.BlockSpec((GM, GM), lambda g: (0, 0)),            # block-diagonal mask
            flag_spec,
        ]
        operands = (x_pad, Wqkv, bqkv, kmask_op, bmask, pass_flag)
        kernel = _make_flat_kernel(G, Mp, Dp)
    else:
        kmask_op = kmask_rows[:, None, :]                        # [Bp, 1, Mp]
        in_specs = common_specs + [
            pl.BlockSpec((G, 1, Mp), lambda g: (g, 0, 0)),       # per-graph key mask
            flag_spec,
        ]
        operands = (x_pad, Wqkv, bqkv, kmask_op, pass_flag)
        kernel = _make_batched_kernel(G, Mp, Dp)

    grid_spec = pltpu.PrefetchScalarGridSpec(
        num_scalar_prefetch=0,
        grid=(Bp // G,),
        in_specs=in_specs,
        out_specs=pl.BlockSpec((G, Mp, Dp), lambda g: (g, 0, 0)),
    )

    vmem_limit = int(min(48 << 20, max(32 << 20, 2 * est_bytes)))
    out_pad = pl.pallas_call(
        kernel,
        out_shape=jax.ShapeDtypeStruct((Bp, Mp, Dp), jnp.bfloat16),
        grid_spec=grid_spec,
        compiler_params=pltpu.CompilerParams(
            dimension_semantics=("parallel",),     # independent graphs -> 2 TCs on v7x
            vmem_limit_bytes=vmem_limit),
    )(*operands)

    return out_pad[batch, pos][:, :D].astype(jnp.float32)       # [N, D]


def reference(x, batch, Wq, Wk, Wv, bq, bk, bv, B):
    """Pure-numpy reference mirroring the PyTorch loop."""
    x = np.asarray(x, np.float32)
    batch = np.asarray(batch)
    out = np.zeros_like(x)
    D = x.shape[1]
    scale = np.sqrt(np.float32(D))
    for i in range(B):
        mask = batch == i
        if not mask.any():
            continue
        nodes = x[mask]
        if nodes.shape[0] <= 1:
            out[mask] = nodes
            continue
        q = nodes @ np.asarray(Wq) + np.asarray(bq)[0]
        k = nodes @ np.asarray(Wk) + np.asarray(bk)[0]
        v = nodes @ np.asarray(Wv) + np.asarray(bv)[0]
        s = (q @ k.T) / scale
        s = s - s.max(axis=-1, keepdims=True)
        e = np.exp(s)
        w = e / e.sum(axis=-1, keepdims=True)
        out[mask] = w @ v
    return out


def _run_case(counts_np, D):
    key = jax.random.PRNGKey(0)
    B = int(len(counts_np))
    M = int(counts_np.max())
    N = int(counts_np.sum())
    batch_np = np.repeat(np.arange(B, dtype=np.int32), counts_np)

    kx, kq, kk, kv, kbq, kbk, kbv = jax.random.split(key, 7)
    x = jax.random.normal(kx, (N, D), jnp.float32)
    # linear-layer parameters in (in -> out) layout, i.e. y = x @ W + b
    lim = 1.0 / np.sqrt(D)
    Wq = jax.random.uniform(kq, (D, D), jnp.float32, -lim, lim)
    Wk = jax.random.uniform(kk, (D, D), jnp.float32, -lim, lim)
    Wv = jax.random.uniform(kv, (D, D), jnp.float32, -lim, lim)
    bq = jax.random.uniform(kbq, (1, D), jnp.float32, -lim, lim)
    bk = jax.random.uniform(kbk, (1, D), jnp.float32, -lim, lim)
    bv = jax.random.uniform(kbv, (1, D), jnp.float32, -lim, lim)

    batch = jnp.asarray(batch_np)
    out = structural_attention(x, batch, Wq, Wk, Wv, bq, bk, bv, B, M)
    out = jax.block_until_ready(out)

    ref = reference(x, batch_np, Wq, Wk, Wv, bq, bk, bv, B)
    # tolerance covers bf16 HBM tiles / bf16 MXU operands + approx softmax reciprocal
    np.testing.assert_allclose(np.asarray(out), ref, rtol=2e-2, atol=2e-2)


if __name__ == "__main__":
    # Small graphs (includes 1-node graphs) -> flat block-diagonal attention path.
    _run_case(np.array([5, 1, 8, 2, 7, 3, 1, 6], np.int32), D=64)
    # One large graph -> batched per-graph attention path (Mp >= 64).
    _run_case(np.array([70, 3, 1, 12], np.int32), D=32)
    print("KERNEL_OK")
</pallas_src>

<mosaic_0001>
module attributes {stable_mosaic.version = 11 : i64} {
  func.func @kernel(%arg0: i32, %arg1: memref<4x8x128xbf16, #tpu.memory_space<vmem>>, %arg2: memref<128x384xbf16, #tpu.memory_space<vmem>>, %arg3: memref<1x384xf32, #tpu.memory_space<vmem>>, %arg4: memref<1x1x32xf32, #tpu.memory_space<vmem>>, %arg5: memref<32x32xf32, #tpu.memory_space<vmem>>, %arg6: memref<4x1x1xf32, #tpu.memory_space<vmem>>, %arg7: memref<4x8x128xbf16, #tpu.memory_space<vmem>>) attributes {dimension_semantics = [#tpu.dimension_semantics<parallel>], iteration_bounds = array<i64: 2>, scalar_prefetch = 0 : i64, scratch_operands = 0 : i64, tpu.core_type = #tpu.core_type<tc>, window_params = [{transform_indices = @transform_0, window_bounds = array<i64: 4, 8, 128>}, {pipeline_mode = #tpu.pipeline_mode<synchronous>, transform_indices = @transform_1, window_bounds = array<i64: 128, 384>}, {pipeline_mode = #tpu.pipeline_mode<synchronous>, transform_indices = @transform_2, window_bounds = array<i64: 1, 384>}, {transform_indices = @transform_3, window_bounds = array<i64: 1, 1, 32>}, {pipeline_mode = #tpu.pipeline_mode<synchronous>, transform_indices = @transform_4, window_bounds = array<i64: 32, 32>}, {transform_indices = @transform_5, window_bounds = array<i64: 4, 1, 1>}, {transform_indices = @transform_6, window_bounds = array<i64: 4, 8, 128>}]} {
    %c0 = arith.constant 0 : index
    %c0_0 = arith.constant 0 : index
    %c0_1 = arith.constant 0 : index
    %0 = vector.load %arg1[%c0, %c0_0, %c0_1] : memref<4x8x128xbf16, #tpu.memory_space<vmem>>, vector<4x8x128xbf16>
    %1 = vector.shape_cast %0 : vector<4x8x128xbf16> to vector<32x128xbf16>
    %c0_2 = arith.constant 0 : index
    %c0_3 = arith.constant 0 : index
    %2 = vector.load %arg2[%c0_2, %c0_3] : memref<128x384xbf16, #tpu.memory_space<vmem>>, vector<128x384xbf16>
    %cst = arith.constant dense<0.000000e+00> : vector<32x384xf32>
    %3 = tpu.matmul %1, %2, %cst {dimension_numbers = #tpu.dot_dimension_numbers<[1], [0], [0], [1], [0, 0, 1, 1], [], []>} : vector<32x128xbf16>, vector<128x384xbf16>, vector<32x384xf32> -> vector<32x384xf32>
    %c0_4 = arith.constant 0 : index
    %c0_5 = arith.constant 0 : index
    %4 = vector.load %arg3[%c0_4, %c0_5] : memref<1x384xf32, #tpu.memory_space<vmem>>, vector<1x384xf32>
    %5 = vector.broadcast %4 : vector<1x384xf32> to vector<32x384xf32>
    %6 = arith.addf %3, %5 : vector<32x384xf32>
    %7 = vector.extract_strided_slice %6 {offsets = [0, 0], sizes = [32, 128], strides = [1, 1]} : vector<32x384xf32> to vector<32x128xf32>
    %8 = arith.truncf %7 : vector<32x128xf32> to vector<32x128xbf16>
    %9 = vector.extract_strided_slice %6 {offsets = [0, 128], sizes = [32, 128], strides = [1, 1]} : vector<32x384xf32> to vector<32x128xf32>
    %10 = arith.truncf %9 : vector<32x128xf32> to vector<32x128xbf16>
    %11 = vector.extract_strided_slice %6 {offsets = [0, 256], sizes = [32, 128], strides = [1, 1]} : vector<32x384xf32> to vector<32x128xf32>
    %12 = arith.truncf %11 : vector<32x128xf32> to vector<32x128xbf16>
    %cst_6 = arith.constant dense<0.000000e+00> : vector<32x32xf32>
    %13 = tpu.matmul %8, %10, %cst_6 {dimension_numbers = #tpu.dot_dimension_numbers<[1], [1], [0], [0], [0, 0, 1, 0], [], []>} : vector<32x128xbf16>, vector<32x128xbf16>, vector<32x32xf32> -> vector<32x32xf32>
    %c0_7 = arith.constant 0 : index
    %c0_8 = arith.constant 0 : index
    %14 = vector.load %arg5[%c0_7, %c0_8] : memref<32x32xf32, #tpu.memory_space<vmem>>, vector<32x32xf32>
    %15 = arith.addf %13, %14 : vector<32x32xf32>
    %c0_9 = arith.constant 0 : index
    %c0_10 = arith.constant 0 : index
    %c0_11 = arith.constant 0 : index
    %16 = vector.load %arg4[%c0_9, %c0_10, %c0_11] : memref<1x1x32xf32, #tpu.memory_space<vmem>>, vector<1x1x32xf32>
    %17 = vector.shape_cast %16 : vector<1x1x32xf32> to vector<1x32xf32>
    %18 = vector.broadcast %17 : vector<1x32xf32> to vector<32x32xf32>
    %19 = arith.addf %15, %18 : vector<32x32xf32>
    %cst_12 = arith.constant dense<0xFF800000> : vector<32xf32>
    %20 = vector.multi_reduction <maximumf>, %19, %cst_12 [1] : vector<32x32xf32> to vector<32xf32>
    %21 = vector.shape_cast %20 : vector<32xf32> to vector<32x1xf32>
    %22 = vector.broadcast %21 : vector<32x1xf32> to vector<32x32xf32>
    %23 = arith.subf %19, %22 : vector<32x32xf32>
    %24 = math.exp %23 : vector<32x32xf32>
    %cst_13 = arith.constant dense<0.000000e+00> : vector<32xf32>
    %25 = vector.multi_reduction <add>, %24, %cst_13 [1] : vector<32x32xf32> to vector<32xf32>
    %26 = vector.shape_cast %25 : vector<32xf32> to vector<32x1xf32>
    %27 = tpu.reciprocal %26 {approx = true} : vector<32x1xf32> -> vector<32x1xf32>
    %28 = vector.broadcast %27 : vector<32x1xf32> to vector<32x32xf32>
    %29 = arith.mulf %24, %28 : vector<32x32xf32>
    %30 = arith.truncf %29 : vector<32x32xf32> to vector<32x32xbf16>
    %cst_14 = arith.constant dense<0.000000e+00> : vector<32x128xf32>
    %31 = tpu.matmul %30, %12, %cst_14 {dimension_numbers = #tpu.dot_dimension_numbers<[1], [0], [0], [1], [0, 0, 1, 1], [], []>} : vector<32x32xbf16>, vector<32x128xbf16>, vector<32x128xf32> -> vector<32x128xf32>
    %c0_15 = arith.constant 0 : index
    %c0_16 = arith.constant 0 : index
    %c0_17 = arith.constant 0 : index
    %32 = vector.load %arg6[%c0_15, %c0_16, %c0_17] : memref<4x1x1xf32, #tpu.memory_space<vmem>>, vector<4x1x1xf32>
    %cst_18 = arith.constant 0.000000e+00 : f32
    %33 = vector.broadcast %cst_18 : f32 to vector<4x1x1xf32>
    %34 = arith.cmpf ogt, %32, %33 : vector<4x1x1xf32>
    %35 = arith.extf %0 : vector<4x8x128xbf16> to vector<4x8x128xf32>
    %36 = vector.shape_cast %31 : vector<32x128xf32> to vector<4x8x128xf32>
    %37 = vector.shape_cast %34 : vector<4x1x1xi1> to vector<4x1x1xi1>
    %38 = vector.broadcast %37 : vector<4x1x1xi1> to vector<4x8x128xi1>
    %39 = arith.select %38, %35, %36 : vector<4x8x128xi1>, vector<4x8x128xf32>
    %40 = arith.truncf %39 : vector<4x8x128xf32> to vector<4x8x128xbf16>
    %c0_19 = arith.constant 0 : index
    %c0_20 = arith.constant 0 : index
    %c0_21 = arith.constant 0 : index
    %41 = vector.load %arg7[%c0_19, %c0_20, %c0_21] : memref<4x8x128xbf16, #tpu.memory_space<vmem>>, vector<4x8x128xbf16>
    tpu.vector_store %arg7[%c0_19, %c0_20, %c0_21], %40 {strides = array<i32>} : memref<4x8x128xbf16, #tpu.memory_space<vmem>>, vector<4x8x128xbf16>,
    return
  }
  func.func @transform_0(%arg0: i32) -> (i32, i32, i32) {
    %c0_i32 = arith.constant 0 : i32
    %c0_i32_0 = arith.constant 0 : i32
    %c0_i32_1 = arith.constant 0 : i32
    return %arg0, %c0_i32, %c0_i32_0 : i32, i32, i32
  }
  func.func @transform_1(%arg0: i32) -> (i32, i32) {
    %c0_i32 = arith.constant 0 : i32
    %c0_i32_0 = arith.constant 0 : i32
    %c0_i32_1 = arith.constant 0 : i32
    return %c0_i32, %c0_i32_0 : i32, i32
  }
  func.func @transform_2(%arg0: i32) -> (i32, i32) {
    %c0_i32 = arith.constant 0 : i32
    %c0_i32_0 = arith.constant 0 : i32
    %c0_i32_1 = arith.constant 0 : i32
    return %c0_i32, %c0_i32_0 : i32, i32
  }
  func.func @transform_3(%arg0: i32) -> (i32, i32, i32) {
    %c0_i32 = arith.constant 0 : i32
    %c0_i32_0 = arith.constant 0 : i32
    %c0_i32_1 = arith.constant 0 : i32
    return %arg0, %c0_i32, %c0_i32_0 : i32, i32, i32
  }
  func.func @transform_4(%arg0: i32) -> (i32, i32) {
    %c0_i32 = arith.constant 0 : i32
    %c0_i32_0 = arith.constant 0 : i32
    %c0_i32_1 = arith.constant 0 : i32
    return %c0_i32, %c0_i32_0 : i32, i32
  }
  func.func @transform_5(%arg0: i32) -> (i32, i32, i32) {
    %c0_i32 = arith.constant 0 : i32
    %c0_i32_0 = arith.constant 0 : i32
    %c0_i32_1 = arith.constant 0 : i32
    return %arg0, %c0_i32, %c0_i32_0 : i32, i32, i32
  }
  func.func @transform_6(%arg0: i32) -> (i32, i32, i32) {
    %c0_i32 = arith.constant 0 : i32
    %c0_i32_0 = arith.constant 0 : i32
    %c0_i32_1 = arith.constant 0 : i32
    return %arg0, %c0_i32, %c0_i32_0 : i32, i32, i32
  }
}

</mosaic_0001>

<bundles_post_ra>
// kernel: tpu_custom_call.1
= control target key start
LH: loop header
LB: loop body
LE: loop exit
PB: predicated region body
PF: predicated region fallthrough
CT: control target
= control target key end

     0   :  { %11 = vsyncpa [#allocation3], 0  ;;  %s1742_s0 = inlined_call_operand.hbm [shape: bf16[8,8,128], index: 0, kind: input, shape index: {}]   ;;  %s1743_s1 = inlined_call_operand.hbm [shape: bf16[128,384], index: 1, kind: input, shape index: {}]   ;;  %s1744_s2 = inlined_call_operand.vmem [shape: f32[1,384], index: 2, kind: input, shape index: {}]   ;;  %s1745_s3 = inlined_call_operand.vmem [shape: f32[2,1,32], index: 3, kind: input, shape index: {}]   ;;  %s1746_s4 = inlined_call_operand.hbm [shape: f32[32,32], index: 4, kind: input, shape index: {}]   ;;  %s1747_s5 = inlined_call_operand.vmem [shape: f32[8,1,1], index: 5, kind: input, shape index: {}]   ;;  %s1748_s6 = inlined_call_operand.hbm [shape: bf16[8,8,128], index: 6, kind: output, shape index: {}]  }
   0x1   :  { %13 = vsyncpa [#allocation3 + $0x1], 0 }
   0x2   :  { %14 = vsyncpa [#allocation6], 0 }
   0x3   :  { %15 = vsyncpa [#allocation4], 0 }
   0x4   :  { %17 = vsyncpa [#allocation4 + $0x1], 0  ;;  %s1437_s21 = smov 0   ;;  %s1439_s22 = smov 0  }
   0x5   :  { %s1441_s23 = smov 0   ;;  %s1443_s24 = smov 0  }
   0x6 LB: > { %s1458_s25 = sadd.s32 4294967295, %s1387_s24   ;;  %s986_s26 = sadd.s32 4294967294, %s1387_s24   ;;  %s1387_s24 = sphi %s1443_s24, %s1768_s24   ;;  %s1383_s23 = sphi %s1441_s23, %s1767_s23   ;;  %s1379_s22 = sphi %s1439_s22, %s1766_s22   ;;  %s1375_s21 = sphi %s1437_s21, %s1765_s21  }
   0x7   : > { %p43_p0 = scmp.ne.s32.totalorder %s1379_s22, %s1375_s21  ;;  %p1749_p1 = scmp.eq.s32.totalorder %s1458_s25, 0 }
   0x8   : > { %p188_p3 = scmp.eq.s32.totalorder %s986_s26, 1  ;;  %p987_p5 = scmp.ge.s32.totalorder %s1387_s24, 1 }
   0x9   : > { %p1467_p4 = por %p1749_p1, %p43_p0  ;;  %p195_p7 = scmp.lt.s32.totalorder %s1387_s24, 3 }
   0xa   : > { %p1472_p6 = por %p188_p3, %p43_p0  ;;  %s1389_s30 = smov [#allocation5]  }
   0xb   : > { %s1752_s27 = scalar_select %p1467_p4, 1, 0 }
   0xc   : > { %s1753_s28 = scalar_select %p1472_p6, 1, 0 }
   0xd   : > { %p1477_p8 = pnand %p987_p5, %p195_p7  ;;  %s207_s7 = sshll.u32 %s1389_s30, 4  ;;  %s1481_s7 = int_to_ptr.vmem [resolvable:$true] %s207_s7 }
   0xe   : > { %s1390_s9 = smov [#allocation7]   ;;  %s1231_s13 = scalar_lea.hbm %s1743_s1, 3072 }
   0xf   : > { %p1113_p9 = pneg %p1477_p8  ;;  %s223_s10 = sshll.u32 %s1390_s9, 4  ;;  %s1492_s10 = int_to_ptr.vmem [resolvable:$true] %s223_s10 }
  0x10   : > { %p1232_p12 = scmp.ne.s32.totalorder %s1743_s1, %s1231_s13  ;;  %p1238_p5 = scmp.lt.u32.totalorder %s1231_s13, %s1743_s1 }
  0x11   : > { %p1488_p11 = pnand %p1113_p9, %p1749_p1 }
  0x13   : > { %p1233_p13 = pneg %p1488_p11 }
  0x15   : > { %p1234_p0 = pnand %p1233_p13, %p1232_p12 }
  0x17   : > { %p1235_p3 = pneg %p1234_p0 }
  0x19   : > { %p1240_p7 = pnand %p1238_p5, %p1235_p3 }
  0x1b   : > { %1243 = shalt.err (!%p1240_p7)
}
  0x1c   : > { %s1244_s18 = scalar_lea.vmem %s1481_s7, 3072  ;;  %p1252_p2 = scmp.lt.s32.totalorder %s1481_s7, %s1481_s7 }
  0x1d   : > { %p1245_p9 = scmp.ne.s32.totalorder %s1481_s7, %s1244_s18  ;;  %p1253_p12 = scmp.lt.s32.totalorder %s1244_s18, %s1244_s18 }
  0x1f   : > { %p1247_p10 = pnand %p1245_p9, %p1233_p13  ;;  %p1254_p0 = por %p1253_p12, %p1252_p2 }
  0x21   : > { %p1248_p1 = pneg %p1247_p10 }
  0x23   : > { %p1255_p6 = pnand %p1254_p0, %p1248_p1 }
  0x25   : > { %1258 = shalt.err (!%p1255_p6)
}
  0x26   : > { %s1391_s19 = smov 192   ;;  %s1392_s20 = smov 12  }
  0x27   : > { %1116 = dma.hbm_to_vmem [thread:$0]  (!%p1488_p11), %s1743_s1, 3072, %s1481_s7, [#allocation6], %s1391_s19, %s1391_s19, %s1392_s20  }
  0x28   : > { %s1259_s12 = scalar_lea.hbm %s1746_s4, 512 }
  0x29   : > { %p1260_p2 = scmp.ne.s32.totalorder %s1746_s4, %s1259_s12  ;;  %p1266_p10 = scmp.lt.u32.totalorder %s1259_s12, %s1746_s4 }
  0x2b   : > { %p1262_p1 = pnand %p1260_p2, %p1233_p13 }
  0x2d   : > { %p1263_p6 = pneg %p1262_p1 }
  0x2f   : > { %p1268_p3 = pnand %p1266_p10, %p1263_p6 }
  0x31   : > { %1271 = shalt.err (!%p1268_p3)
}
  0x32   : > { %s1272_s7 = scalar_lea.vmem %s1492_s10, 512  ;;  %p1280_p12 = scmp.lt.s32.totalorder %s1492_s10, %s1492_s10 }
  0x33   : > { %p1273_p5 = scmp.ne.s32.totalorder %s1492_s10, %s1272_s7  ;;  %p1281_p0 = scmp.lt.s32.totalorder %s1272_s7, %s1272_s7 }
  0x35   : > { %p1275_p7 = pnand %p1273_p5, %p1233_p13  ;;  %p1282_p2 = por %p1281_p0, %p1280_p12 }
  0x37   : > { %p1276_p9 = pneg %p1275_p7 }
  0x39   : > { %p1283_p1 = pnand %p1282_p2, %p1276_p9 }
  0x3b   : > { %1286 = shalt.err (!%p1283_p1)
}
  0x3c   : > { %s1393_s17 = smov 128   ;;  %s1394_s18 = smov 8  }
  0x3d   : > { %1119 = dma.hbm_to_vmem [thread:$0]  (!%p1488_p11), %s1746_s4, 512, %s1492_s10, [#allocation6], %s1393_s17, %s1393_s17, %s1394_s18  }
  0x3e   : > { %s1547_s26 = sadd.s32 1, %s1387_s24   ;;  %s30_s9 = sadd.s32 1, %s1383_s23 }
  0x3f   : > { %s27_s30 = ssub.s32 %s1387_s24, %s1547_s26  ;;  %p37_p6 = scmp.ne.s32.totalorder %s1383_s23, %s1379_s22 }
  0x40   : > { %p28_p13 = scmp.eq.s32.totalorder %s27_s30, 0  ;;  %p38_p10 = scmp.eq.s32.totalorder %s1387_s24, 0 }
  0x41   : > { %p1756_p5 = scmp.eq.s32.totalorder %s1458_s25, 1  ;;  %p1130_p9 = scmp.lt.s32.totalorder %s1387_s24, 2 }
  0x42   : > { %s1556_s11 = scalar_select %p28_p13, %s1383_s23, %s30_s9  }
  0x43   : > { %p39_p3 = por %p38_p10, %p37_p6  ;;  %p1560_p7 = por %p1756_p5, %p37_p6 }
  0x44   : > { %s237_s8 = sand.u32 1, %s1383_s23   ;;  %s1034_s10 = sshll.u32 %s1387_s24, 8 }
  0x45   : > { %s1757_s12 = scalar_select %p1560_p7, 1, 0 }
  0x46   : > { %s991_s13 = sshll.u32 %s237_s8, 4  ;;  %s1570_s16 = scalar_lea.hbm %s1742_s0, %s1034_s10 }
  0x47   : > { %s241_s7 = scalar_lea.vmem [#allocation2], %s991_s13  ;;  %p1574_p11 = pnand %p1130_p9, %p39_p3 }
  0x48   : > { %s248_s17 = sshll.u32 %s241_s7, 4  ;;  %s1578_s19 = scalar_lea.sflag [#allocation3], %s237_s8  ;;  %s1572_s17 = int_to_ptr.vmem [resolvable:$true] %s248_s17 }
  0x49   : > { %s1287_s20 = scalar_lea.hbm %s1570_s16, 256  ;;  %p1289_p0 = pneg %p1574_p11 }
  0x4a   : > { %p1288_p12 = scmp.ne.s32.totalorder %s1570_s16, %s1287_s20  ;;  %s1292_s13 = scalar_lea.hbm %s1742_s0, 512 }
  0x4b   : > { %p1293_p13 = scmp.lt.u32.totalorder %s1570_s16, %s1742_s0  ;;  %p1294_p6 = scmp.lt.u32.totalorder %s1292_s13, %s1287_s20 }
  0x4c   : > { %p1290_p2 = pnand %p1289_p0, %p1288_p12  ;;  %p1296_p3 = scmp.lt.u32.totalorder %s1287_s20, %s1570_s16 }
  0x4d   : > { %p1295_p10 = por %p1294_p6, %p1293_p13 }
  0x4e   : > { %p1291_p1 = pneg %p1290_p2 }
  0x4f   : > { %p1297_p5 = por %p1296_p3, %p1295_p10 }
  0x51   : > { %p1298_p9 = pnand %p1297_p5, %p1291_p1 }
  0x53   : > { %1301 = shalt.err (!%p1298_p9)
}
  0x54   : > { %s1302_s8 = scalar_lea.vmem %s1572_s17, 256  ;;  %s1395_s15 = smov [#allocation2]  }
  0x55   : > { %p1303_p12 = scmp.ne.s32.totalorder %s1572_s17, %s1302_s8  ;;  %s1307_s7 = sshll.u32 %s1395_s15, 4  ;;  %s1308_s7 = int_to_ptr.vmem [resolvable:$false] %s1307_s7 }
  0x56   : > { %s1309_s30 = scalar_lea.vmem %s1308_s7, 512  ;;  %p1310_p4 = scmp.lt.s32.totalorder %s1572_s17, %s1308_s7 }
  0x57   : > { %p1305_p2 = pnand %p1303_p12, %p1289_p0  ;;  %p1311_p13 = scmp.lt.s32.totalorder %s1309_s30, %s1302_s8 }
  0x59   : > { %p1306_p7 = pneg %p1305_p2  ;;  %p1312_p6 = por %p1311_p13, %p1310_p4 }
  0x5b   : > { %p1313_p10 = pnand %p1312_p6, %p1306_p7 }
  0x5d   : > { %1316 = shalt.err (!%p1313_p10)
}
  0x5e   : > { %s1396_s20 = smov 64   ;;  %s1397_s9 = smov 4  }
  0x5f   : > { %1123 = dma.hbm_to_vmem [thread:$0]  (!%p1574_p11), %s1570_s16, 256, %s1572_s17, %s1578_s19, %s1396_s20, %s1396_s20, %s1397_s9  }
  0x60   : > { %274 = sbr.rel (%p1477_p8) target bundleno = 1150 (0x47e), region = 44  ;;  %s1609_s13 = sand.u32 (!%p1477_p8), 1, %s1379_s22  }
  0x61   : > { %s995_s10 = sshll.u32 (!%p1477_p8), %s1609_s13, 4  ;;  %s277_s14 = scalar_lea.sflag (!%p1477_p8), [#allocation3], %s1609_s13 }
  0x62   : > { %s1615_s8 = scalar_lea.vmem (!%p1477_p8), [#allocation2], %s995_s10  ;;  %p1759_p4 = scmp.ne.s32.totalorder (!%p1477_p8), %s1752_s27, 0 }
  0x67   : > { %1362 = dma.done.wait (%p1759_p4), %s277_s14, 256  }
  0x68   : > { %1364 = vsyncadd (%p1759_p4), %s277_s14, 4294967040  ;;  %p1760_p7 = scmp.eq.s32.totalorder %s1458_s25, 0 }
  0x6a   : > { %1366 = dma.done.wait (%p1760_p7), [#allocation6], 3584   ;;  %p1761_p8 = pmov %p1760_p7 }
  0x6b   : > { %v1398_v0 = vmov 0   ;;  %v1179_v1 = vld [vmem:[#allocation5 + $0x4] ss:$12 sps:$4 sm:$0xff]   ;;  %v1181_v2 = vld [vmem:[#allocation5] ss:$12 sps:$4 sm:$0xff]   ;;  %v373_v19 = vlaneseq  ;;  %p325_p11 = scmp.lt.s32.totalorder %s1458_s25, 1 }
  0x6c   : > { %1368 = vsyncadd (%p1761_p8), [#allocation6], 4294963712  ;;  %560 = vmatprep.mubr.bf16.mxu0 %v1398_v0  ;;  %1178 = vset.pattern.permute.xlu1 %v1398_v0  ;;  %v1182_v3 = vld [vmem:[#allocation5 + $0x1c] ss:$12 sps:$4 sm:$0xff]   ;;  %v1184_v4 = vld [vmem:[#allocation5 + $0x18] ss:$12 sps:$4 sm:$0xff]  }
  0x6d   : > { %1177 = vset.pattern.permute.xlu0 %v1398_v0  ;;  %528 = vmatprep.subr.bf16.mxu0 %v1179_v1  ;;  %v1185_v5 = vld [vmem:[#allocation5 + $0x34] ss:$12 sps:$4 sm:$0xff]   ;;  %v1187_v6 = vld [vmem:[#allocation5 + $0x30] ss:$12 sps:$4 sm:$0xff]   ;;  %v1188_v7 = vld [vmem:[#allocation5 + $0x4c] ss:$12 sps:$4 sm:$0xff]  }
  0x6e   : > { %529 = vmatpush1.bf16.msra.mxu0 %v1181_v2  ;;  %v1629_v8 = vld [vmem:[%s1615_s8] sm:$0xff]   ;;  %v1194_v12 = vld [vmem:[#allocation5 + $0x7c] ss:$12 sps:$4 sm:$0xff]   ;;  %v1200_v16 = vld [vmem:[#allocation5 + $0xac] ss:$12 sps:$4 sm:$0xff]   ;;  %v1638_v20 = vshrl.u32 %v373_v19, 7 }
  0x6f   : > { %530 = vmatprep.subr.bf16.mxu0 %v1182_v3  ;;  %v1190_v9 = vld [vmem:[#allocation5 + $0x48] ss:$12 sps:$4 sm:$0xff]   ;;  %v1191_v10 = vld [vmem:[#allocation5 + $0x64] ss:$12 sps:$4 sm:$0xff]   ;;  %v1193_v11 = vld [vmem:[#allocation5 + $0x60] ss:$12 sps:$4 sm:$0xff]   ;;  %1081 = vmatprep.mubr.bf16.mxu1 %v1629_v8 }
  0x70   : > { %v1196_v13 = vld [vmem:[#allocation5 + $0x78] ss:$12 sps:$4 sm:$0xff]   ;;  %v1197_v14 = vld [vmem:[#allocation5 + $0x94] ss:$12 sps:$4 sm:$0xff]   ;;  %v1199_v15 = vld [vmem:[#allocation5 + $0x90] ss:$12 sps:$4 sm:$0xff]  }
  0x71   : > { %v1202_v17 = vld [vmem:[#allocation5 + $0xa8] ss:$12 sps:$4 sm:$0xff]   ;;  %v1641_v21 = vsub.s32 0, %v1638_v20  ;;  %v1646_v22 = vld [vmem:[%s1744_s2] sm:$0x7]  ;;  %v379_v23 = vsub.s32 1, %v1638_v20 }
  0x72   : > { %531 = vmatpush1.bf16.msra.mxu0 %v1184_v4  ;;  %v1635_v18 = vld [vmem:[%s1615_s8 + $0x8] sm:$0xff]   ;;  %s326_s16 = scalar_select %p325_p11, %s1458_s25, 1  ;;  %v638_v54 = vld [vmem:[#allocation7 + $0x10] sm:$0xff]  ;;  %v636_v55 = vld [vmem:[#allocation7] sm:$0xff]  ;;  %vm700_vm0 = vcmask 261120  }
  0x73   : > { %532 = vmatprep.subr.bf16.mxu0 %v1185_v5  ;;  %v376_v24 = vrot.slane %v1646_v22, %v1641_v21  ;;  %v380_v26 = vrot.slane %v1646_v22, %v379_v23  ;;  %v1205_v46 = vld [vmem:[#allocation5 + $0x8] ss:$12 sps:$4 sm:$0xff]   ;;  %v1206_v47 = vld [vmem:[#allocation5 + $0x20] ss:$12 sps:$4 sm:$0xff]   ;;  %v1207_v48 = vld [vmem:[#allocation5 + $0x38] ss:$12 sps:$4 sm:$0xff]  }
  0x74   : > { %1065 = vmatprep.subr.bf16.mxu1 %v1205_v46  ;;  %v1208_v49 = vld [vmem:[#allocation5 + $0x50] ss:$12 sps:$4 sm:$0xff]   ;;  %v1209_v50 = vld [vmem:[#allocation5 + $0x68] ss:$12 sps:$4 sm:$0xff]   ;;  %v1210_v51 = vld [vmem:[#allocation5 + $0x80] ss:$12 sps:$4 sm:$0xff]   ;;  %s327_s19 = scalar_lea.vmem %s1745_s3, %s326_s16 }
  0x75   : > { %1066 = vmatpush3.bf16.msra.mxu1 %v1205_v46  ;;  %v1211_v52 = vld [vmem:[#allocation5 + $0x98] ss:$12 sps:$4 sm:$0xff]   ;;  %v1212_v53 = vld [vmem:[#allocation5 + $0xb0] ss:$12 sps:$4 sm:$0xff]   ;;  %v1026_v58 = vld [vmem:[%s327_s19] ss:$0 sm:$0xff] }
  0x76   : > { %533 = vmatpush1.bf16.msra.mxu0 %v1187_v6  ;;  %1067 = vmatprep.subr.bf16.mxu1 %v1206_v47  ;;  %v639_v57 = vld [vmem:[#allocation7 + $0x18] sm:$0xff]  ;;  %v637_v61 = vld [vmem:[#allocation7 + $0x8] sm:$0xff]  ;;  %s999_s15 = sshll.u32 %s1458_s25, 2  ;;  %s323_s9 = scalar_lea.vmem [#allocation8], %s995_s10 }
  0x77   : > { %534 = vmatprep.subr.bf16.mxu0 %v1188_v7  ;;  %p329_p0 = scmp.lt.s32.totalorder %s999_s15, 7  ;;  %s876_s14 = sshll.u32 %s323_s9, 4  ;;  %s1693_s14 = int_to_ptr.vmem [resolvable:$true] %s876_s14 }
  0x78   : > { %s1035_s8 = sshll.u32 %s1458_s25, 8  ;;  %s863_s16 = scalar_lea.sflag [#allocation4], %s1609_s13 }
  0x79   : > { %1068 = vmatpush3.bf16.msra.mxu1 %v1206_v47  ;;  %s1770_s15 = smov (!%p329_p0, %s999_s15), 7  ;;  %s1698_s29 = scalar_lea.hbm %s1748_s6, %s1035_s8 }
  0x7a   : > { %535 = vmatpush1.bf16.msra.mxu0 %v1190_v9  ;;  %1069 = vmatprep.subr.bf16.mxu1 %v1207_v48  ;;  %s331_s20 = scalar_lea.vmem %s1747_s5, %s1770_s15  ;;  %s1317_s25 = scalar_lea.vmem %s1693_s14, 256 }
  0x7b   : > { %536 = vmatprep.subr.bf16.mxu0 %v1191_v10  ;;  %p1318_p1 = scmp.ne.s32.totalorder %s1693_s14, %s1317_s25  ;;  %p1762_p3 = scmp.ne.s32.totalorder %s1757_s12, 0 }
  0x7c   : > { %s1399_s17 = smov [#allocation8]  }
  0x7d   : > { %1070 = vmatpush3.bf16.msra.mxu1 %v1207_v48  ;;  %p1319_p5 = pnand %p1318_p1, %p1762_p3  ;;  %s1321_s18 = sshll.u32 %s1399_s17, 4  ;;  %s1322_s18 = int_to_ptr.vmem [resolvable:$false] %s1321_s18 }
  0x7e   : > { %537 = vmatpush1.bf16.msra.mxu0 %v1193_v11  ;;  %1071 = vmatprep.subr.bf16.mxu1 %v1208_v49  ;;  %s1323_s19 = scalar_lea.vmem %s1322_s18, 512  ;;  %p1324_p12 = scmp.lt.s32.totalorder %s1693_s14, %s1322_s18 }
  0x7f   : > { %538 = vmatprep.subr.bf16.mxu0 %v1194_v12  ;;  %p1320_p9 = pneg %p1319_p5  ;;  %p1325_p2 = scmp.lt.s32.totalorder %s1323_s19, %s1317_s25 }
  0x81   : > { %1072 = vmatpush3.bf16.msra.mxu1 %v1208_v49  ;;  %v805_v49 = vld [vmem:[%s331_s20 + $0x3] sm:$0x1]  ;;  %p1326_p13 = por %p1325_p2, %p1324_p12 }
  0x82   : > { %539 = vmatpush1.bf16.msra.mxu0 %v1196_v13  ;;  %1073 = vmatprep.subr.bf16.mxu1 %v1209_v50  ;;  %vm809_vm4 = vcmp.gt.f32.partialorder %v805_v49, 0.0 }
  0x83   : > { %540 = vmatprep.subr.bf16.mxu0 %v1197_v14  ;;  %p1327_p6 = pnand %p1326_p13, %p1320_p9 }
  0x85   : > { %1074 = vmatpush3.bf16.msra.mxu1 %v1209_v50  ;;  %v802_v50 = vld [vmem:[%s331_s20] sm:$0x1] }
  0x86   : > { %541 = vmatpush1.bf16.msra.mxu0 %v1199_v15  ;;  %1075 = vmatprep.subr.bf16.mxu1 %v1210_v51  ;;  %vm806_vm3 = vcmp.gt.f32.partialorder %v802_v50, 0.0 }
  0x87   : > { %542 = vmatprep.subr.bf16.mxu0 %v1200_v16 }
  0x89   : > { %1076 = vmatpush3.bf16.msra.mxu1 %v1210_v51 }
  0x8a   : > { %543 = vmatpush1.bf16.msra.mxu0 %v1202_v17  ;;  %1077 = vmatprep.subr.bf16.mxu1 %v1211_v52 }
  0x8d   : > { %561 = vmatmul.mubr.bf16.vlgmr.msra.gmra.mrb[0].mxu0 %v1629_v8  ;;  %1078 = vmatpush3.bf16.msra.mxu1 %v1211_v52 }
  0x8e   : > { %570 = vmatprep.mubr.bf16.mxu0 %v1398_v0  ;;  %1079 = vmatprep.subr.bf16.mxu1 %v1212_v53 }
  0x91   : > { %1080 = vmatpush3.bf16.msra.mxu1 %v1212_v53 }
  0x94   : > { %1082 = vmatmul.mubr.bf16.vlgmr.msra.gmra.mrb[0].mxu1 %v1635_v18 }
  0x95   : > { %571 = vmatmul.mubr.bf16.gmra.mrb[4].mxu0 %v1635_v18 }
 0x160   : > { %v562_v25 = vpop.f32.mrb[0].mxu0 }
 0x161   : > { %v564_v27 = vpop.f32.mrb[1].mxu0  ;;  %v563_v29 = vadd.f32 %v562_v25, %v376_v24 }
 0x162   : > { %v566_v28 = vpop.f32.mrb[2].mxu0  ;;  %v565_v32 = vadd.f32 %v564_v27, %v380_v26 }
 0x163   : > { %v567_v30 = vadd.f32 %v566_v28, %v376_v24  ;;  %v568_v31 = vpop.f32.mrb[3].mxu0 }
 0x164   : > { %v569_v33 = vadd.f32 %v568_v31, %v380_v26 }
 0x165   : > { %v630_v34 = vpack.c.bf16 %v567_v30, %v563_v29 }
 0x166   : > { %v632_v35 = vpack.c.bf16 %v569_v33, %v565_v32 }
 0x167   : > { %1089 = vmatprep.mubr.bf16.mxu0 %v630_v34  ;;  %v1083_v13 = vpop.f32.mrb[0].mxu1 }
 0x168   : > { %v572_v36 = vpop.f32.mrb[4].mxu0  ;;  %1085 = vmatprep.subr.bf16.mxu0 %v632_v35 }
 0x169   : > { %v574_v37 = vpop.f32.mrb[5].mxu0  ;;  %1086 = vmatpush3.bf16.xpose.msra.mxu0 %v632_v35  ;;  %v573_v39 = vadd.f32 %v572_v36, %v376_v24 }
 0x16a   : > { %v576_v38 = vpop.f32.mrb[6].mxu0  ;;  %v575_v42 = vadd.f32 %v574_v37, %v380_v26 }
 0x16b   : > { %v577_v40 = vadd.f32 %v576_v38, %v376_v24  ;;  %v578_v41 = vpop.f32.mrb[7].mxu0  ;;  %v383_v38 = vsub.s32 2, %v1638_v20  ;;  %v803_v20 = vld [vmem:[%s331_s20 + $0x1] sm:$0x1] }
 0x16c   : > { %v579_v43 = vadd.f32 %v578_v41, %v380_v26  ;;  %v615_v41 = vpop.f32.mrb[1].mxu1  ;;  %vm807_vm1 = vcmp.gt.f32.partialorder %v803_v20, 0.0 }
 0x16d   : > { %v631_v44 = vpack.c.bf16 %v577_v40, %v573_v39  ;;  %v384_v39 = vrot.slane %v1646_v22, %v383_v38  ;;  %v804_v22 = vld [vmem:[%s331_s20 + $0x2] sm:$0x1]  ;;  %v815_v51 = vsel %vm807_vm1, 1, %v1398_v0 }
 0x16e   : > { %v633_v45 = vpack.c.bf16 %v579_v43, %v575_v42  ;;  %v1084_v43 = vpop.f32.mrb[2].mxu1  ;;  %vm808_vm2 = vcmp.gt.f32.partialorder %v804_v22, 0.0  ;;  %v825_v53 = vrot.slane %v815_v51, %v1641_v21 }
 0x16f   : > { %v624_v40 = vadd.f32 %v1083_v13, %v384_v39  ;;  %v616_v42 = vadd.f32 %v615_v41, %v384_v39  ;;  %v816_v52 = vsel %vm808_vm2, 1, %v1398_v0  ;;  %v810_v13 = vunpack.c.l.bf16 %v1629_v8 }
 0x170   : > { %1087 = vmatprep.subr.bf16.mxu0 %v633_v45 }
 0x171   : > { %1088 = vmatpush3.bf16.xpose.msra.mxu0 %v633_v45  ;;  %v618_v45 = vpop.f32.mrb[3].mxu1 }
 0x172   : > { %v619_v46 = vadd.f32 %v618_v45, %v384_v39 }
 0x174   : > { %v634_v48 = vpack.c.bf16 %v619_v46, %v616_v42 }
 0x176   : > { %1093 = vmatprep.subr.bf16.mxu1 %v634_v48 }
 0x177   : > { %1094 = vmatpush3.bf16.msra.mxu1 %v634_v48 }
 0x178   : > { %1090 = vmatmul.mubr.bf16.vlgmr.msra.gmra.mrb[8].mxu0 %v631_v44  ;;  %v627_v44 = vadd.f32 %v1084_v43, %v384_v39 }
 0x17a   : > { %v635_v47 = vpack.c.bf16 %v627_v44, %v624_v40 }
 0x17c   : > { %1095 = vmatprep.subr.bf16.mxu1 %v635_v47 }
 0x17d   : > { %1096 = vmatpush3.bf16.msra.mxu1 %v635_v47 }
 0x24b   : > { %v1091_v56 = vpop.f32.mrb[8].mxu0 }
 0x24c   : > { %v683_v59 = vadd.f32 %v1091_v56, %v638_v54  ;;  %v674_v60 = vpop.f32.mrb[9].mxu0  ;;  %v814_v54 = vsel %vm806_vm3, 1, %v1398_v0  ;;  %v829_v56 = vrot.slane %v816_v52, %v1641_v21 }
 0x24d   : > { %v675_v62 = vadd.f32 %v674_v60, %v636_v55  ;;  %v1092_v63 = vpop.f32.mrb[10].mxu0  ;;  %v821_v55 = vrot.slane %v814_v54, %v1641_v21 }
 0x24e   : > { %v686_v1 = vadd.f32 %v1092_v63, %v639_v57  ;;  %v677_v2 = vpop.f32.mrb[11].mxu0  ;;  %v698_v3 = vadd.f32 %v1026_v58, %v683_v59  ;;  %v817_v57 = vsel %vm809_vm4, 1, %v1398_v0 }
 0x24f   : > { %v678_v4 = vadd.f32 %v677_v2, %v637_v61  ;;  %v696_v5 = vadd.f32 %v1026_v58, %v675_v62 }
 0x250   : > { %v707_v6 = vsel %vm700_vm0, %v698_v3, -inf  ;;  %v699_v7 = vadd.f32 %v1026_v58, %v686_v1 }
 0x251   : > { %708 = vmax.xlane.f32.xlu1 %v707_v6  ;;  %v701_v9 = vsel %vm700_vm0, %v696_v5, -inf  ;;  %v697_v10 = vadd.f32 %v1026_v58, %v678_v4  ;;  %v833_v58 = vrot.slane %v817_v57, %v1641_v21 }
 0x252   : > { %702 = vmax.xlane.f32.xlu0 %v701_v9  ;;  %v710_v11 = vsel %vm700_vm0, %v699_v7, -inf }
 0x253   : > { %v704_v12 = vsel %vm700_vm0, %v697_v10, -inf }
 0x255   : > { %711 = vmax.xlane.f32.xlu1 %v710_v11 }
 0x256   : > { %705 = vmax.xlane.f32.xlu0 %v704_v12  ;;  %v812_v12 = vunpack.c.l.bf16 %v1635_v18 }
 0x2de   : > { %v709_v14 = vpop.xlane.xlu1 %708 }
 0x2df   : > { %v715_v15 = vsub.f32 %v698_v3, %v709_v14  ;;  %v703_v16 = vpop.xlane.xlu0 %702  ;;  %v813_v14 = vunpack.c.h.bf16 %v1635_v18 }
 0x2e0   : > { %v713_v17 = vsub.f32 %v696_v5, %v703_v16  ;;  %v811_v16 = vunpack.c.h.bf16 %v1629_v8 }
 0x2e1   : > { %v721_v19 = vmul.f32 1.442695, %v715_v15 }
 0x2e2   : > { %v717_v23 = vmul.f32 1.442695, %v713_v17  ;;  %v712_v24 = vpop.xlane.xlu1 %711 }
 0x2e3   : > { %v716_v25 = vsub.f32 %v699_v7, %v712_v24  ;;  %v706_v26 = vpop.xlane.xlu0 %705 }
 0x2e4   : > { %1215 = vpow2.f32 %v717_v23  ;;  %v714_v27 = vsub.f32 %v697_v10, %v706_v26 }
 0x2e5   : > { %1217 = vpow2.f32 %v721_v19  ;;  %v723_v28 = vmul.f32 1.442695, %v716_v25 }
 0x2e6   : > { %v719_v29 = vmul.f32 1.442695, %v714_v27 }
 0x2e8   : > { %1219 = vpow2.f32 %v719_v29 }
 0x2e9   : > { %1221 = vpow2.f32 %v723_v28 }
 0x2ee   : > { %v1216_v30 = vpop.eup %1215 }
 0x2ef   : > { %v725_v31 = vsel %vm700_vm0, %v1216_v30, 0.0  ;;  %v1663_v32 = vpop.eup %1217 }
 0x2f0   : > { %726 = vadd.xlane.f32.xlu0 %v725_v31  ;;  %v731_v34 = vsel %vm700_vm0, %v1663_v32, 0.0 }
 0x2f2   : > { %v1220_v33 = vpop.eup %1219 }
 0x2f3   : > { %v728_v35 = vsel %vm700_vm0, %v1220_v33, 0.0  ;;  %v1222_v36 = vpop.eup %1221 }
 0x2f4   : > { %732 = vadd.xlane.f32.xlu0 %v731_v34  ;;  %729 = vadd.xlane.f32.xlu1 %v728_v35  ;;  %v734_v37 = vsel %vm700_vm0, %v1222_v36, 0.0 }
 0x2f8   : > { %735 = vadd.xlane.f32.xlu1 %v734_v37 }
 0x309   : > { %838 = vperm.xlu1 %1178, %v825_v53  }
 0x30a   : > { %835 = vperm.xlu0 %1177, %v821_v55  }
 0x30d   : > { %841 = vperm.xlu1 %1178, %v829_v56  }
 0x311   : > { %844 = vperm.xlu1 %1178, %v833_v58  }
 0x37d   : > { %v727_v59 = vpop.xlane.xlu0 %726 }
 0x37e   : > { %1223 = vrcp.f32 %v727_v59 }
 0x381   : > { %v730_v60 = vpop.xlane.xlu1 %729  ;;  %v733_v61 = vpop.xlane.xlu0 %732 }
 0x382   : > { %1225 = vrcp.f32 %v730_v60 }
 0x383   : > { %1227 = vrcp.f32 %v733_v61 }
 0x385   : > { %v736_v62 = vpop.xlane.xlu1 %735 }
 0x386   : > { %1229 = vrcp.f32 %v736_v62 }
 0x388   : > { %v1224_v63 = vpop.eup %1223 }
 0x389   : > { %v741_v2 = vmul.f32 %v1224_v63, %v1216_v30  ;;  %v839_v9 = vpop.permute.xlu1 %838  ;;  %v836_v11 = vpop.permute.xlu0 %835 }
 0x38a   : > { %vm846_vm5 = vcmp.eq.s32.totalorder %v836_v11, 1  ;;  %vm847_vm8 = vcmp.eq.s32.totalorder %v839_v9, 1 }
 0x38c   : > { %v1226_v1 = vpop.eup %1225 }
 0x38d   : > { %v742_v3 = vmul.f32 %v1226_v1, %v1220_v33  ;;  %v1228_v4 = vpop.eup %1227  ;;  %v842_v10 = vpop.permute.xlu1 %841 }
 0x38e   : > { %v743_v6 = vmul.f32 %v1228_v4, %v1663_v32  ;;  %vm848_vm6 = vcmp.eq.s32.totalorder %v842_v10, 1 }
 0x38f   : > { %v745_v5 = vpack.c.bf16 %v742_v3, %v741_v2 }
 0x390   : > { %v1230_v0 = vpop.eup %1229 }
 0x391   : > { %v744_v21 = vmul.f32 %v1230_v0, %v1222_v36  ;;  %1097 = vmatprep.mubr.msk.bf16.mxu1 %vm700_vm0, %v745_v5  ;;  %v845_v15 = vpop.permute.xlu1 %844 }
 0x392   : > { %vm849_vm7 = vcmp.eq.s32.totalorder %v845_v15, 1 }
 0x393   : > { %v746_v7 = vpack.c.bf16 %v744_v21, %v743_v6 }
 0x395   : > { %1098 = vmatmul.mubr.msk.bf16.vlgmr.msra.gmra.mrb[4].mxu1 %vm700_vm0, %v746_v7 }
 0x468   : > { %v1099_v17 = vpop.f32.mrb[4].mxu1 }
 0x469   : > { %v852_v19 = vsel %vm848_vm6, %v812_v12, %v1099_v17  ;;  %v787_v23 = vpop.f32.mrb[5].mxu1 }
 0x46a   : > { %v850_v24 = vsel %vm846_vm5, %v810_v13, %v787_v23  ;;  %v1100_v25 = vpop.f32.mrb[6].mxu1 }
 0x46b   : > { %v853_v26 = vsel %vm849_vm7, %v813_v14, %v1100_v25  ;;  %v790_v8 = vpop.f32.mrb[7].mxu1 }
 0x46c   : > { %v1044_v18 = vpack.c.bf16 %v853_v26, %v852_v19  ;;  %v851_v27 = vsel %vm847_vm8, %v811_v16, %v790_v8 }
 0x46d   : > { %v1039_v28 = vpack.c.bf16 %v851_v27, %v850_v24 }
 0x46e   : > { %1046 = vst [vmem:[%s323_s9 + $0x8] sm:$0xff] %v1044_v18  }
 0x46f   : > { %1040 = vst [vmem:[%s323_s9] sm:$0xff] %v1039_v28  }
 0x470   : > { %1330 = shalt.err (!%p1327_p6)
}
 0x471   : > { %s1331_s15 = scalar_lea.hbm %s1698_s29, 256  ;;  %s1335_s20 = scalar_lea.hbm %s1748_s6, 512 }
 0x472   : > { %p1332_p10 = scmp.ne.s32.totalorder %s1698_s29, %s1331_s15  ;;  %p1336_p8 = scmp.lt.u32.totalorder %s1698_s29, %s1748_s6 }
 0x473   : > { %p1337_p11 = scmp.lt.u32.totalorder %s1335_s20, %s1331_s15  ;;  %p1339_p1 = scmp.lt.u32.totalorder %s1331_s15, %s1698_s29 }
 0x474   : > { %p1333_p4 = pnand %p1332_p10, %p1762_p3 }
 0x475   : > { %p1338_p0 = por %p1337_p11, %p1336_p8 }
 0x476   : > { %p1334_p7 = pneg %p1333_p4 }
 0x477   : > { %p1340_p5 = por %p1339_p1, %p1338_p0 }
 0x479   : > { %p1341_p9 = pnand %p1340_p5, %p1334_p7 }
 0x47b   : > { %1344 = shalt.err (!%p1341_p9)
}
 0x47c   : > { %s1400_s10 = smov 64   ;;  %s1401_s27 = smov 4  }
 0x47d   : > { %1111 = dma.vmem_to_hbm [thread:$0]  (%p1762_p3), %s1693_s14, 256, %s1698_s29, %s863_s16, %s1400_s10, %s1400_s10, %s1401_s27  }
 0x47e PF: > { %s891_s25 = sand.u32 1, %s1375_s21   ;;  %p1763_p12 = scmp.ne.s32.totalorder %s1753_s28, 0 }
 0x47f   : > { %p1764_p2 = scmp.ge.s32.totalorder %s1387_s24, 2  ;;  %s892_s17 = scalar_lea.sflag [#allocation4], %s891_s25 }
 0x481   : > { %p1125_p13 = pnand %p1764_p2, %p1763_p12 }
 0x483   : > { %1370 = dma.done.wait (!%p1125_p13), %s892_s17, 256  }
 0x484   : > { %1372 = vsyncadd (!%p1125_p13), %s892_s17, 4294967040  ;;  %p20_p6 = scmp.ge.s32.totalorder %s1547_s26, 4   ;;  %s1765_s21 = smov %s1379_s22 }
 0x485   : > { %s1766_s22 = smov %s1383_s23  ;;  %s1767_s23 = smov %s1556_s11 }
 0x486   : > { %s1768_s24 = smov %s1547_s26  ;;  %22 = sbr.rel (!%p20_p6) target bundleno = 6 (0x6), region = 103 }
 0x48d   :  { %897 = vsyncpa [#allocation3], 1 }
 0x48e   :  { %899 = vsyncpa [#allocation3 + $0x1], 1 }
 0x48f   :  { %900 = vsyncpa [#allocation6], 1 }
 0x490   :  { %901 = vsyncpa [#allocation4], 1 }
 0x491   :  { %903 = vsyncpa [#allocation4 + $0x1], 1 }

</bundles_post_ra>
